<compile_context>
chip_gen: v6e
topology: v6e:2x2x1
jax: 0.10.0
libtpu: 0.0.40
codegen_flags: <defaults>
</compile_context>

<pallas_src>
import jax
import jax.numpy as jnp
from jax.experimental import pallas as pl
from jax.experimental.pallas import tpu as pltpu

_TW = 128  # lane-width tile; all coarser reversal happens in the index_map.


def _flip_kernel(flip_ref, x_ref, o_ref):
    """Copy one (TM, 128) tile, reversing its lanes iff flip_ref[0] != 0."""
    do_flip = flip_ref[0] != 0

    @pl.when(do_flip)
    def _reverse():
        x = x_ref[...]
        tw = x.shape[-1]                       # == _TW == 128, power of two
        # (1, TW) lane index; jnp.where broadcasts it over the TM rows.
        lane = jax.lax.broadcasted_iota(jnp.int32, (1, tw), 1)
        s = 1
        while s < tw:
            # One XOR-network step: y[i] = x[i ^ s].
            # pltpu.roll follows jnp.roll semantics: roll(x, k)[i] = x[(i-k) % n].
            minus = pltpu.roll(x, shift=s, axis=1)        # x[i - s]
            plus = pltpu.roll(x, shift=tw - s, axis=1)    # x[i + s]
            x = jnp.where((lane & s) != 0, minus, plus)
            s *= 2
        o_ref[...] = x

    @pl.when(jnp.logical_not(do_flip))
    def _copy():
        o_ref[...] = x_ref[...]


def _pick_row_tile(rows):
    """Fixed large row tile (multiple of 8); cdiv grid handles the ragged tail."""
    if rows < 8:
        return rows                   # single full-extent (tiny) row block
    return min(512, (rows // 8) * 8)


def _hflip_pallas(x2, flip_flag, tm, tw):
    """Conditionally reverse the last axis of a 2-D (rows, Wp) array.

    Wp must be a multiple of tw (the wrapper pads).  flip_flag is a (1,) int32
    array prefetched into SMEM; it drives both the block schedule and the
    in-tile reverse-vs-copy choice.
    """
    rows, wp = x2.shape
    n_w = wp // tw

    def in_map(i, j, flip):
        # Coarse reversal lives in the DMA schedule: when flipping, output
        # column-block j is produced from input column-block n_w-1-j.
        return (i, jnp.where(flip[0] != 0, n_w - 1 - j, j))

    return pl.pallas_call(
        _flip_kernel,
        out_shape=jax.ShapeDtypeStruct((rows, wp), x2.dtype),
        grid_spec=pltpu.PrefetchScalarGridSpec(
            num_scalar_prefetch=1,
            grid=(pl.cdiv(rows, tm), n_w),
            in_specs=[pl.BlockSpec((tm, tw), in_map)],
            out_specs=pl.BlockSpec((tm, tw), lambda i, j, flip: (i, j)),
        ),
        compiler_params=pltpu.CompilerParams(
            dimension_semantics=("parallel", "parallel"),
        ),
    )(flip_flag, x2)


def sound_random_horizontal_flip(data, key, p=0.5):
    """Pallas equivalent of SoundRandomHorizontalFlip.forward.

    data: (C, H, W) array.  key: jax PRNG key for the Bernoulli(p) draw
    (mirrors `torch.rand(1) < self.p`, which is host-side RNG glue).
    """
    assert 0.0 <= p <= 1.0
    C, H, W = data.shape
    rows = C * H
    x2 = data.reshape(rows, W)

    # Pad the time axis up to a lane-aligned multiple of 128.  Reversal of the
    # padded array followed by a flag-dependent window slice recovers the
    # exact result for any W (including W < 128 and non-multiples of 128).
    wp = max(_TW, ((W + _TW - 1) // _TW) * _TW)
    pad = wp - W
    if pad:
        x2 = jnp.pad(x2, ((0, 0), (0, pad)))

    # Bernoulli(p) draw, prefetched into SMEM as a (1,) int32 flag.
    do_flip = (jax.random.uniform(key, ()) < p).astype(jnp.int32)
    flip_flag = do_flip.reshape((1,))

    tm = _pick_row_tile(rows)
    y2 = _hflip_pallas(x2, flip_flag, tm, _TW)

    if pad:
        # flipped:   y2 = [zeros(pad), rev(x)]  -> take columns [pad : pad+W)
        # unflipped: y2 = [x, zeros(pad)]       -> take columns [0 : W)
        start = do_flip * pad
        y2 = jax.lax.dynamic_slice_in_dim(y2, start, W, axis=1)

    return y2.reshape(C, H, W)


if __name__ == "__main__":
    key = jax.random.PRNGKey(0)
    k_data, k_flip = jax.random.split(key)

    # Small (channels, freq, time) sound map.
    C, H, W = 4, 16, 128
    x = jax.random.normal(k_data, (C, H, W), dtype=jnp.float32)

    # Deterministic branches: p=1.0 always flips, p=0.0 never flips.
    out_flip = jax.block_until_ready(sound_random_horizontal_flip(x, k_flip, p=1.0))
    out_keep = jax.block_until_ready(sound_random_horizontal_flip(x, k_flip, p=0.0))
    assert out_flip.shape == x.shape and out_flip.dtype == x.dtype
    assert bool(jnp.array_equal(out_flip, jnp.flip(x, axis=-1))), "flip branch mismatch"
    assert bool(jnp.array_equal(out_keep, x)), "no-flip branch mismatch"

    # Random draw at p=0.5 (same RNG draw the wrapper makes).
    out_rand = jax.block_until_ready(sound_random_horizontal_flip(x, k_flip, p=0.5))
    took_flip = bool(jax.random.uniform(k_flip, ()) < 0.5)
    ref_rand = jnp.flip(x, axis=-1) if took_flip else x
    assert bool(jnp.array_equal(out_rand, ref_rand)), "p=0.5 branch mismatch"

    # Non-128-multiple W: exercises the pad-and-slice path.
    W2 = 300
    x_odd = jax.random.normal(k_data, (C, H, W2), dtype=jnp.float32)
    out_odd_f = jax.block_until_ready(sound_random_horizontal_flip(x_odd, k_flip, p=1.0))
    out_odd_k = jax.block_until_ready(sound_random_horizontal_flip(x_odd, k_flip, p=0.0))
    assert bool(jnp.array_equal(out_odd_f, jnp.flip(x_odd, axis=-1))), "padded flip mismatch"
    assert bool(jnp.array_equal(out_odd_k, x_odd)), "padded no-flip mismatch"

    # Wider time axis: exercises the reversed-block index_map (n_w > 1).
    W3 = 512
    x_wide = jax.random.normal(k_data, (C, H, W3), dtype=jnp.float32)
    out_wide = jax.block_until_ready(sound_random_horizontal_flip(x_wide, k_flip, p=1.0))
    assert bool(jnp.array_equal(out_wide, jnp.flip(x_wide, axis=-1))), "wide-W mismatch"

    print("KERNEL_OK")
</pallas_src>

<mosaic_0001>
module attributes {stable_mosaic.version = 11 : i64} {
  func.func @_flip_kernel(%arg0: i32, %arg1: i32, %arg2: memref<1xi32, #tpu.memory_space<smem>>, %arg3: memref<64x128xf32, #tpu.memory_space<vmem>>, %arg4: memref<64x128xf32, #tpu.memory_space<vmem>>) attributes {dimension_semantics = [#tpu.dimension_semantics<parallel>, #tpu.dimension_semantics<parallel>], iteration_bounds = array<i64: 1, 1>, scalar_prefetch = 1 : i64, scratch_operands = 0 : i64, tpu.core_type = #tpu.core_type<tc>, window_params = [{transform_indices = @transform_0, window_bounds = array<i64: 64, 128>}, {transform_indices = @transform_1, window_bounds = array<i64: 64, 128>}]} {
    %c0 = arith.constant 0 : index
    %0 = memref.load %arg2[%c0] : memref<1xi32, #tpu.memory_space<smem>>
    %c0_i32 = arith.constant 0 : i32
    %1 = arith.cmpi ne, %0, %c0_i32 : i32
    %2 = arith.extui %1 : i1 to i32
    %c0_i32_0 = arith.constant 0 : i32
    %3 = arith.cmpi ne, %2, %c0_i32_0 : i32
    scf.if %3 {
      %c0_2 = arith.constant 0 : index
      %c0_3 = arith.constant 0 : index
      %7 = vector.load %arg3[%c0_2, %c0_3] : memref<64x128xf32, #tpu.memory_space<vmem>>, vector<64x128xf32>
      %8 = tpu.iota {dimensions = array<i32: 1>} : vector<1x128xi32>
      %c1_i32 = arith.constant 1 : i32
      %9 = tpu.dynamic_rotate %7 by %c1_i32 dim 1 : vector<64x128xf32>, i32 -> vector<64x128xf32>
      %c127_i32 = arith.constant 127 : i32
      %10 = tpu.dynamic_rotate %7 by %c127_i32 dim 1 : vector<64x128xf32>, i32 -> vector<64x128xf32>
      %c1_i32_4 = arith.constant 1 : i32
      %11 = vector.broadcast %c1_i32_4 : i32 to vector<1x128xi32>
      %12 = arith.andi %8, %11 : vector<1x128xi32>
      %c0_i32_5 = arith.constant 0 : i32
      %13 = vector.broadcast %c0_i32_5 : i32 to vector<1x128xi32>
      %14 = arith.cmpi ne, %12, %13 : vector<1x128xi32>
      %15 = vector.shape_cast %14 : vector<1x128xi1> to vector<1x128xi1>
      %16 = vector.broadcast %15 : vector<1x128xi1> to vector<64x128xi1>
      %17 = arith.select %16, %9, %10 : vector<64x128xi1>, vector<64x128xf32>
      %c2_i32 = arith.constant 2 : i32
      %18 = tpu.dynamic_rotate %17 by %c2_i32 dim 1 : vector<64x128xf32>, i32 -> vector<64x128xf32>
      %c126_i32 = arith.constant 126 : i32
      %19 = tpu.dynamic_rotate %17 by %c126_i32 dim 1 : vector<64x128xf32>, i32 -> vector<64x128xf32>
      %c2_i32_6 = arith.constant 2 : i32
      %20 = vector.broadcast %c2_i32_6 : i32 to vector<1x128xi32>
      %21 = arith.andi %8, %20 : vector<1x128xi32>
      %c0_i32_7 = arith.constant 0 : i32
      %22 = vector.broadcast %c0_i32_7 : i32 to vector<1x128xi32>
      %23 = arith.cmpi ne, %21, %22 : vector<1x128xi32>
      %24 = vector.shape_cast %23 : vector<1x128xi1> to vector<1x128xi1>
      %25 = vector.broadcast %24 : vector<1x128xi1> to vector<64x128xi1>
      %26 = arith.select %25, %18, %19 : vector<64x128xi1>, vector<64x128xf32>
      %c4_i32 = arith.constant 4 : i32
      %27 = tpu.dynamic_rotate %26 by %c4_i32 dim 1 : vector<64x128xf32>, i32 -> vector<64x128xf32>
      %c124_i32 = arith.constant 124 : i32
      %28 = tpu.dynamic_rotate %26 by %c124_i32 dim 1 : vector<64x128xf32>, i32 -> vector<64x128xf32>
      %c4_i32_8 = arith.constant 4 : i32
      %29 = vector.broadcast %c4_i32_8 : i32 to vector<1x128xi32>
      %30 = arith.andi %8, %29 : vector<1x128xi32>
      %c0_i32_9 = arith.constant 0 : i32
      %31 = vector.broadcast %c0_i32_9 : i32 to vector<1x128xi32>
      %32 = arith.cmpi ne, %30, %31 : vector<1x128xi32>
      %33 = vector.shape_cast %32 : vector<1x128xi1> to vector<1x128xi1>
      %34 = vector.broadcast %33 : vector<1x128xi1> to vector<64x128xi1>
      %35 = arith.select %34, %27, %28 : vector<64x128xi1>, vector<64x128xf32>
      %c8_i32 = arith.constant 8 : i32
      %36 = tpu.dynamic_rotate %35 by %c8_i32 dim 1 : vector<64x128xf32>, i32 -> vector<64x128xf32>
      %c120_i32 = arith.constant 120 : i32
      %37 = tpu.dynamic_rotate %35 by %c120_i32 dim 1 : vector<64x128xf32>, i32 -> vector<64x128xf32>
      %c8_i32_10 = arith.constant 8 : i32
      %38 = vector.broadcast %c8_i32_10 : i32 to vector<1x128xi32>
      %39 = arith.andi %8, %38 : vector<1x128xi32>
      %c0_i32_11 = arith.constant 0 : i32
      %40 = vector.broadcast %c0_i32_11 : i32 to vector<1x128xi32>
      %41 = arith.cmpi ne, %39, %40 : vector<1x128xi32>
      %42 = vector.shape_cast %41 : vector<1x128xi1> to vector<1x128xi1>
      %43 = vector.broadcast %42 : vector<1x128xi1> to vector<64x128xi1>
      %44 = arith.select %43, %36, %37 : vector<64x128xi1>, vector<64x128xf32>
      %c16_i32 = arith.constant 16 : i32
      %45 = tpu.dynamic_rotate %44 by %c16_i32 dim 1 : vector<64x128xf32>, i32 -> vector<64x128xf32>
      %c112_i32 = arith.constant 112 : i32
      %46 = tpu.dynamic_rotate %44 by %c112_i32 dim 1 : vector<64x128xf32>, i32 -> vector<64x128xf32>
      %c16_i32_12 = arith.constant 16 : i32
      %47 = vector.broadcast %c16_i32_12 : i32 to vector<1x128xi32>
      %48 = arith.andi %8, %47 : vector<1x128xi32>
      %c0_i32_13 = arith.constant 0 : i32
      %49 = vector.broadcast %c0_i32_13 : i32 to vector<1x128xi32>
      %50 = arith.cmpi ne, %48, %49 : vector<1x128xi32>
      %51 = vector.shape_cast %50 : vector<1x128xi1> to vector<1x128xi1>
      %52 = vector.broadcast %51 : vector<1x128xi1> to vector<64x128xi1>
      %53 = arith.select %52, %45, %46 : vector<64x128xi1>, vector<64x128xf32>
      %c32_i32 = arith.constant 32 : i32
      %54 = tpu.dynamic_rotate %53 by %c32_i32 dim 1 : vector<64x128xf32>, i32 -> vector<64x128xf32>
      %c96_i32 = arith.constant 96 : i32
      %55 = tpu.dynamic_rotate %53 by %c96_i32 dim 1 : vector<64x128xf32>, i32 -> vector<64x128xf32>
      %c32_i32_14 = arith.constant 32 : i32
      %56 = vector.broadcast %c32_i32_14 : i32 to vector<1x128xi32>
      %57 = arith.andi %8, %56 : vector<1x128xi32>
      %c0_i32_15 = arith.constant 0 : i32
      %58 = vector.broadcast %c0_i32_15 : i32 to vector<1x128xi32>
      %59 = arith.cmpi ne, %57, %58 : vector<1x128xi32>
      %60 = vector.shape_cast %59 : vector<1x128xi1> to vector<1x128xi1>
      %61 = vector.broadcast %60 : vector<1x128xi1> to vector<64x128xi1>
      %62 = arith.select %61, %54, %55 : vector<64x128xi1>, vector<64x128xf32>
      %c64_i32 = arith.constant 64 : i32
      %63 = tpu.dynamic_rotate %62 by %c64_i32 dim 1 : vector<64x128xf32>, i32 -> vector<64x128xf32>
      %c64_i32_16 = arith.constant 64 : i32
      %64 = tpu.dynamic_rotate %62 by %c64_i32_16 dim 1 : vector<64x128xf32>, i32 -> vector<64x128xf32>
      %c64_i32_17 = arith.constant 64 : i32
      %65 = vector.broadcast %c64_i32_17 : i32 to vector<1x128xi32>
      %66 = arith.andi %8, %65 : vector<1x128xi32>
      %c0_i32_18 = arith.constant 0 : i32
      %67 = vector.broadcast %c0_i32_18 : i32 to vector<1x128xi32>
      %68 = arith.cmpi ne, %66, %67 : vector<1x128xi32>
      %69 = vector.shape_cast %68 : vector<1x128xi1> to vector<1x128xi1>
      %70 = vector.broadcast %69 : vector<1x128xi1> to vector<64x128xi1>
      %71 = arith.select %70, %63, %64 : vector<64x128xi1>, vector<64x128xf32>
      %c0_19 = arith.constant 0 : index
      %c0_20 = arith.constant 0 : index
      %72 = vector.load %arg4[%c0_19, %c0_20] : memref<64x128xf32, #tpu.memory_space<vmem>>, vector<64x128xf32>
      tpu.vector_store %arg4[%c0_19, %c0_20], %71 {strides = array<i32>} : memref<64x128xf32, #tpu.memory_space<vmem>>, vector<64x128xf32>,
    } else {
    }
    %true = arith.constant true
    %4 = arith.xori %1, %true : i1
    %5 = arith.extui %4 : i1 to i32
    %c0_i32_1 = arith.constant 0 : i32
    %6 = arith.cmpi ne, %5, %c0_i32_1 : i32
    scf.if %6 {
      %c0_2 = arith.constant 0 : index
      %c0_3 = arith.constant 0 : index
      %7 = vector.load %arg3[%c0_2, %c0_3] : memref<64x128xf32, #tpu.memory_space<vmem>>, vector<64x128xf32>
      %c0_4 = arith.constant 0 : index
      %c0_5 = arith.constant 0 : index
      %8 = vector.load %arg4[%c0_4, %c0_5] : memref<64x128xf32, #tpu.memory_space<vmem>>, vector<64x128xf32>
      tpu.vector_store %arg4[%c0_4, %c0_5], %7 {strides = array<i32>} : memref<64x128xf32, #tpu.memory_space<vmem>>, vector<64x128xf32>,
    } else {
    }
    return
  }
  func.func @transform_0(%arg0: i32, %arg1: i32, %arg2: memref<1xi32, #tpu.memory_space<smem>>) -> (i32, i32) {
    %c0 = arith.constant 0 : index
    %0 = memref.load %arg2[%c0] : memref<1xi32, #tpu.memory_space<smem>>
    %c0_i32 = arith.constant 0 : i32
    %1 = arith.cmpi ne, %0, %c0_i32 : i32
    %c0_i32_0 = arith.constant 0 : i32
    %2 = arith.subi %c0_i32_0, %arg1 : i32
    %3 = arith.select %1, %2, %arg1 : i32
    %c0_i32_1 = arith.constant 0 : i32
    return %arg0, %3 : i32, i32
  }
  func.func @transform_1(%arg0: i32, %arg1: i32, %arg2: memref<1xi32, #tpu.memory_space<smem>>) -> (i32, i32) {
    %c0_i32 = arith.constant 0 : i32
    return %arg0, %arg1 : i32, i32
  }
}

</mosaic_0001>

<bundles_post_ra>
// kernel: tpu_custom_call.1
= control target key start
LH: loop header
LB: loop body
LE: loop exit
PB: predicated region body
PF: predicated region fallthrough
CT: control target
= control target key end

     0   :  { %8 = vsyncpa [#allocation5], 0  ;;  %s618_s0 = inlined_call_operand.<no memory space> [shape: s32[1], index: 0, kind: input, shape index: {}]   ;;  %s619_s1 = inlined_call_operand.hbm [shape: f32[64,128], index: 1, kind: input, shape index: {}]   ;;  %s620_s2 = inlined_call_operand.hbm [shape: f32[64,128], index: 2, kind: output, shape index: {}]  }
   0x1   :  { %9 = vsyncpa [#allocation6], 0  ;;  %s440_s9 = smov [#allocation4]  }
   0x2   :  { %s21_s10 = sshll.u32 %s440_s9, 4  ;;  %s22_s10 = int_to_ptr.vmem [resolvable:$true] %s21_s10 }
   0x3   :  { %s404_s11 = scalar_lea.vmem %s22_s10, 1024  ;;  %p409_p1 = scmp.lt.s32.totalorder %s22_s10, %s22_s10 }
   0x4   :  { %p405_p0 = scmp.ne.s32.totalorder %s22_s10, %s404_s11  ;;  %p410_p2 = scmp.lt.s32.totalorder %s404_s11, %s404_s11 }
   0x6   :  { %p411_p3 = por %p410_p2, %p409_p1 }
   0x8   :  { %p412_p4 = pnand %p411_p3, %p405_p0 }
   0xa   :  { %415 = shalt.err (!%p412_p4)
}
   0xb   :  { %s441_s12 = smov 128   ;;  %s442_s13 = smov 8  }
   0xc   :  { %27 = dma.hbm_to_vmem [thread:$0]  %s619_s1, 1024, %s22_s10, [#allocation5], %s441_s12, %s441_s12, %s442_s13  }
   0xd   :  { %436 = dma.done.wait [#allocation5], 1024  }
   0xe   :  { %437 = vsyncadd [#allocation5], 4294966272  ;;  %p377_p5 = scmp.eq.s32.totalorder %s618_s0, 0 }
   0xf   :  { %s443_s18 = smov (!%p377_p5), 1   ;;  %s444_s1 = smov (!%p377_p5), 127  }
  0x10   :  { %39 = sbr.rel (%p377_p5) target bundleno = 942 (0x3ae), region = 13  ;;  %s445_s19 = smov (!%p377_p5), 2  }
  0x11   :  { %s446_s20 = smov (!%p377_p5), 126   ;;  %s447_s21 = smov (!%p377_p5), 4  }
  0x12   :  { %s448_s22 = smov (!%p377_p5), 124   ;;  %s449_s23 = smov (!%p377_p5), 8  }
  0x13   :  { %s450_s24 = smov (!%p377_p5), 120   ;;  %s451_s25 = smov (!%p377_p5), 16  }
  0x14   :  { %s452_s26 = smov (!%p377_p5), 112   ;;  %s453_s27 = smov (!%p377_p5), 32  }
  0x15   :  { %v42_v0 = vld [vmem:[#allocation4 + $0x10] sm:$0xff]  ;;  %v40_v1 = vld [vmem:[#allocation4] sm:$0xff]  ;;  %v43_v2 = vld [vmem:[#allocation4 + $0x18] sm:$0xff]  ;;  %v48_v10 = vlaneseq  ;;  %s454_s28 = smov 96   ;;  %s455_s29 = smov 64  }
  0x16   :  { %54 = vrot.lane.b32.xlu1 %v42_v0, %s443_s18  ;;  %50 = vrot.lane.b32.xlu0 %v40_v1, %s443_s18  ;;  %v41_v3 = vld [vmem:[#allocation4 + $0x8] sm:$0xff]  ;;  %v44_v5 = vld [vmem:[#allocation4 + $0x20] sm:$0xff]  ;;  %v47_v6 = vld [vmem:[#allocation4 + $0x38] sm:$0xff] }
  0x17   :  { %v45_v4 = vld [vmem:[#allocation4 + $0x28] sm:$0xff]  ;;  %v46_v7 = vld [vmem:[#allocation4 + $0x30] sm:$0xff]  ;;  %v481_v13 = vand.u32 127, %v48_v10 }
  0x19   :  { %v82_v16 = vand.u32 1, %v481_v13  ;;  %v126_v42 = vand.u32 2, %v481_v13 }
  0x1a   :  { %56 = vrot.lane.b32.xlu1 %v43_v2, %s443_s18  ;;  %52 = vrot.lane.b32.xlu0 %v41_v3, %s443_s18 }
  0x1b   :  { %vm484_vm0 = vcmp.ne.s32.totalorder %v82_v16, 0  ;;  %vm505_vm1 = vcmp.ne.s32.totalorder %v126_v42, 0 }
  0x1e   :  { %60 = vrot.lane.b32.xlu1 %v45_v4, %s443_s18  ;;  %58 = vrot.lane.b32.xlu0 %v44_v5, %s443_s18 }
  0x22   :  { %64 = vrot.lane.b32.xlu1 %v47_v6, %s443_s18  ;;  %62 = vrot.lane.b32.xlu0 %v46_v7, %s443_s18 }
  0x26   :  { %68 = vrot.lane.b32.xlu1 %v41_v3, %s444_s1  ;;  %66 = vrot.lane.b32.xlu0 %v40_v1, %s444_s1 }
  0x2a   :  { %72 = vrot.lane.b32.xlu1 %v43_v2, %s444_s1  ;;  %70 = vrot.lane.b32.xlu0 %v42_v0, %s444_s1 }
  0x2e   :  { %76 = vrot.lane.b32.xlu1 %v45_v4, %s444_s1  ;;  %74 = vrot.lane.b32.xlu0 %v44_v5, %s444_s1  ;;  %v170_v4 = vand.u32 4, %v481_v13 }
  0x30   :  { %vm526_vm2 = vcmp.ne.s32.totalorder %v170_v4, 0 }
  0x32   :  { %80 = vrot.lane.b32.xlu1 %v47_v6, %s444_s1  ;;  %78 = vrot.lane.b32.xlu0 %v46_v7, %s444_s1 }
  0x88   :  { %v55_v8 = vpop.permute.xlu1 %54  ;;  %v51_v9 = vpop.permute.xlu0 %50 }
  0x8c   :  { %v57_v11 = vpop.permute.xlu1 %56  ;;  %v53_v12 = vpop.permute.xlu0 %52 }
  0x90   :  { %v61_v14 = vpop.permute.xlu1 %60  ;;  %v59_v15 = vpop.permute.xlu0 %58 }
  0x94   :  { %v65_v17 = vpop.permute.xlu1 %64  ;;  %v63_v18 = vpop.permute.xlu0 %62 }
  0x98   :  { %v69_v20 = vpop.permute.xlu1 %68  ;;  %v67_v21 = vpop.permute.xlu0 %66 }
  0x99   :  { %v87_v22 = vsel %vm484_vm0, %v53_v12, %v69_v20  ;;  %v86_v23 = vsel %vm484_vm0, %v51_v9, %v67_v21 }
  0x9a   :  { %96 = vrot.lane.b32.xlu1 %v87_v22, %s445_s19  ;;  %94 = vrot.lane.b32.xlu0 %v86_v23, %s445_s19 }
  0x9c   :  { %v73_v24 = vpop.permute.xlu1 %72  ;;  %v71_v25 = vpop.permute.xlu0 %70 }
  0x9d   :  { %v89_v26 = vsel %vm484_vm0, %v57_v11, %v73_v24  ;;  %v88_v27 = vsel %vm484_vm0, %v55_v8, %v71_v25 }
  0x9e   :  { %100 = vrot.lane.b32.xlu1 %v89_v26, %s445_s19  ;;  %98 = vrot.lane.b32.xlu0 %v88_v27, %s445_s19 }
  0xa0   :  { %v77_v28 = vpop.permute.xlu1 %76  ;;  %v75_v29 = vpop.permute.xlu0 %74 }
  0xa1   :  { %v91_v30 = vsel %vm484_vm0, %v61_v14, %v77_v28  ;;  %v90_v31 = vsel %vm484_vm0, %v59_v15, %v75_v29 }
  0xa2   :  { %104 = vrot.lane.b32.xlu1 %v91_v30, %s445_s19  ;;  %102 = vrot.lane.b32.xlu0 %v90_v31, %s445_s19 }
  0xa4   :  { %v81_v32 = vpop.permute.xlu1 %80  ;;  %v79_v33 = vpop.permute.xlu0 %78 }
  0xa5   :  { %v93_v34 = vsel %vm484_vm0, %v65_v17, %v81_v32  ;;  %v92_v35 = vsel %vm484_vm0, %v63_v18, %v79_v33 }
  0xa6   :  { %108 = vrot.lane.b32.xlu1 %v93_v34, %s445_s19  ;;  %106 = vrot.lane.b32.xlu0 %v92_v35, %s445_s19 }
  0xaa   :  { %112 = vrot.lane.b32.xlu1 %v87_v22, %s446_s20  ;;  %110 = vrot.lane.b32.xlu0 %v86_v23, %s446_s20 }
  0xae   :  { %116 = vrot.lane.b32.xlu1 %v89_v26, %s446_s20  ;;  %114 = vrot.lane.b32.xlu0 %v88_v27, %s446_s20 }
  0xb2   :  { %120 = vrot.lane.b32.xlu1 %v91_v30, %s446_s20  ;;  %118 = vrot.lane.b32.xlu0 %v90_v31, %s446_s20  ;;  %v214_v31 = vand.u32 8, %v481_v13 }
  0xb4   :  { %vm547_vm3 = vcmp.ne.s32.totalorder %v214_v31, 0 }
  0xb6   :  { %124 = vrot.lane.b32.xlu1 %v93_v34, %s446_s20  ;;  %122 = vrot.lane.b32.xlu0 %v92_v35, %s446_s20 }
 0x10c   :  { %v97_v36 = vpop.permute.xlu1 %96  ;;  %v95_v37 = vpop.permute.xlu0 %94 }
 0x110   :  { %v101_v38 = vpop.permute.xlu1 %100  ;;  %v99_v39 = vpop.permute.xlu0 %98 }
 0x114   :  { %v105_v40 = vpop.permute.xlu1 %104  ;;  %v103_v41 = vpop.permute.xlu0 %102 }
 0x118   :  { %v109_v43 = vpop.permute.xlu1 %108  ;;  %v107_v44 = vpop.permute.xlu0 %106 }
 0x11c   :  { %v113_v46 = vpop.permute.xlu1 %112  ;;  %v111_v47 = vpop.permute.xlu0 %110 }
 0x11d   :  { %v131_v48 = vsel %vm505_vm1, %v97_v36, %v113_v46  ;;  %v130_v49 = vsel %vm505_vm1, %v95_v37, %v111_v47 }
 0x11e   :  { %140 = vrot.lane.b32.xlu1 %v131_v48, %s447_s21  ;;  %138 = vrot.lane.b32.xlu0 %v130_v49, %s447_s21 }
 0x120   :  { %v117_v50 = vpop.permute.xlu1 %116  ;;  %v115_v51 = vpop.permute.xlu0 %114 }
 0x121   :  { %v133_v52 = vsel %vm505_vm1, %v101_v38, %v117_v50  ;;  %v132_v53 = vsel %vm505_vm1, %v99_v39, %v115_v51 }
 0x122   :  { %144 = vrot.lane.b32.xlu1 %v133_v52, %s447_s21  ;;  %142 = vrot.lane.b32.xlu0 %v132_v53, %s447_s21 }
 0x124   :  { %v121_v54 = vpop.permute.xlu1 %120  ;;  %v119_v55 = vpop.permute.xlu0 %118 }
 0x125   :  { %v135_v56 = vsel %vm505_vm1, %v105_v40, %v121_v54  ;;  %v134_v57 = vsel %vm505_vm1, %v103_v41, %v119_v55 }
 0x126   :  { %148 = vrot.lane.b32.xlu1 %v135_v56, %s447_s21  ;;  %146 = vrot.lane.b32.xlu0 %v134_v57, %s447_s21 }
 0x128   :  { %v125_v58 = vpop.permute.xlu1 %124  ;;  %v123_v59 = vpop.permute.xlu0 %122 }
 0x129   :  { %v137_v60 = vsel %vm505_vm1, %v109_v43, %v125_v58  ;;  %v136_v61 = vsel %vm505_vm1, %v107_v44, %v123_v59 }
 0x12a   :  { %152 = vrot.lane.b32.xlu1 %v137_v60, %s447_s21  ;;  %150 = vrot.lane.b32.xlu0 %v136_v61, %s447_s21 }
 0x12e   :  { %156 = vrot.lane.b32.xlu1 %v131_v48, %s448_s22  ;;  %154 = vrot.lane.b32.xlu0 %v130_v49, %s448_s22 }
 0x132   :  { %160 = vrot.lane.b32.xlu1 %v133_v52, %s448_s22  ;;  %158 = vrot.lane.b32.xlu0 %v132_v53, %s448_s22 }
 0x136   :  { %164 = vrot.lane.b32.xlu1 %v135_v56, %s448_s22  ;;  %162 = vrot.lane.b32.xlu0 %v134_v57, %s448_s22  ;;  %v258_v57 = vand.u32 16, %v481_v13 }
 0x138   :  { %vm568_vm4 = vcmp.ne.s32.totalorder %v258_v57, 0 }
 0x13a   :  { %168 = vrot.lane.b32.xlu1 %v137_v60, %s448_s22  ;;  %166 = vrot.lane.b32.xlu0 %v136_v61, %s448_s22 }
 0x190   :  { %v141_v62 = vpop.permute.xlu1 %140  ;;  %v139_v63 = vpop.permute.xlu0 %138 }
 0x194   :  { %v145_v0 = vpop.permute.xlu1 %144  ;;  %v143_v1 = vpop.permute.xlu0 %142 }
 0x198   :  { %v149_v2 = vpop.permute.xlu1 %148  ;;  %v147_v3 = vpop.permute.xlu0 %146 }
 0x19c   :  { %v153_v5 = vpop.permute.xlu1 %152  ;;  %v151_v6 = vpop.permute.xlu0 %150 }
 0x1a0   :  { %v157_v8 = vpop.permute.xlu1 %156  ;;  %v155_v9 = vpop.permute.xlu0 %154 }
 0x1a1   :  { %v175_v10 = vsel %vm526_vm2, %v141_v62, %v157_v8  ;;  %v174_v11 = vsel %vm526_vm2, %v139_v63, %v155_v9 }
 0x1a2   :  { %184 = vrot.lane.b32.xlu1 %v175_v10, %s449_s23  ;;  %182 = vrot.lane.b32.xlu0 %v174_v11, %s449_s23 }
 0x1a4   :  { %v161_v12 = vpop.permute.xlu1 %160  ;;  %v159_v14 = vpop.permute.xlu0 %158 }
 0x1a5   :  { %v177_v15 = vsel %vm526_vm2, %v145_v0, %v161_v12  ;;  %v176_v16 = vsel %vm526_vm2, %v143_v1, %v159_v14 }
 0x1a6   :  { %188 = vrot.lane.b32.xlu1 %v177_v15, %s449_s23  ;;  %186 = vrot.lane.b32.xlu0 %v176_v16, %s449_s23 }
 0x1a8   :  { %v165_v17 = vpop.permute.xlu1 %164  ;;  %v163_v18 = vpop.permute.xlu0 %162 }
 0x1a9   :  { %v179_v19 = vsel %vm526_vm2, %v149_v2, %v165_v17  ;;  %v178_v20 = vsel %vm526_vm2, %v147_v3, %v163_v18 }
 0x1aa   :  { %192 = vrot.lane.b32.xlu1 %v179_v19, %s449_s23  ;;  %190 = vrot.lane.b32.xlu0 %v178_v20, %s449_s23 }
 0x1ac   :  { %v169_v21 = vpop.permute.xlu1 %168  ;;  %v167_v22 = vpop.permute.xlu0 %166 }
 0x1ad   :  { %v181_v23 = vsel %vm526_vm2, %v153_v5, %v169_v21  ;;  %v180_v24 = vsel %vm526_vm2, %v151_v6, %v167_v22 }
 0x1ae   :  { %196 = vrot.lane.b32.xlu1 %v181_v23, %s449_s23  ;;  %194 = vrot.lane.b32.xlu0 %v180_v24, %s449_s23 }
 0x1b2   :  { %200 = vrot.lane.b32.xlu1 %v175_v10, %s450_s24  ;;  %198 = vrot.lane.b32.xlu0 %v174_v11, %s450_s24 }
 0x1b6   :  { %204 = vrot.lane.b32.xlu1 %v177_v15, %s450_s24  ;;  %202 = vrot.lane.b32.xlu0 %v176_v16, %s450_s24 }
 0x1ba   :  { %208 = vrot.lane.b32.xlu1 %v179_v19, %s450_s24  ;;  %206 = vrot.lane.b32.xlu0 %v178_v20, %s450_s24  ;;  %v302_v20 = vand.u32 32, %v481_v13 }
 0x1bc   :  { %vm589_vm5 = vcmp.ne.s32.totalorder %v302_v20, 0 }
 0x1be   :  { %212 = vrot.lane.b32.xlu1 %v181_v23, %s450_s24  ;;  %210 = vrot.lane.b32.xlu0 %v180_v24, %s450_s24 }
 0x214   :  { %v185_v25 = vpop.permute.xlu1 %184  ;;  %v183_v26 = vpop.permute.xlu0 %182 }
 0x218   :  { %v189_v27 = vpop.permute.xlu1 %188  ;;  %v187_v28 = vpop.permute.xlu0 %186 }
 0x21c   :  { %v193_v29 = vpop.permute.xlu1 %192  ;;  %v191_v30 = vpop.permute.xlu0 %190 }
 0x220   :  { %v197_v32 = vpop.permute.xlu1 %196  ;;  %v195_v33 = vpop.permute.xlu0 %194 }
 0x224   :  { %v201_v35 = vpop.permute.xlu1 %200  ;;  %v199_v36 = vpop.permute.xlu0 %198 }
 0x225   :  { %v219_v37 = vsel %vm547_vm3, %v185_v25, %v201_v35  ;;  %v218_v38 = vsel %vm547_vm3, %v183_v26, %v199_v36 }
 0x226   :  { %228 = vrot.lane.b32.xlu1 %v219_v37, %s451_s25  ;;  %226 = vrot.lane.b32.xlu0 %v218_v38, %s451_s25 }
 0x228   :  { %v205_v39 = vpop.permute.xlu1 %204  ;;  %v203_v40 = vpop.permute.xlu0 %202 }
 0x229   :  { %v221_v41 = vsel %vm547_vm3, %v189_v27, %v205_v39  ;;  %v220_v42 = vsel %vm547_vm3, %v187_v28, %v203_v40 }
 0x22a   :  { %232 = vrot.lane.b32.xlu1 %v221_v41, %s451_s25  ;;  %230 = vrot.lane.b32.xlu0 %v220_v42, %s451_s25 }
 0x22c   :  { %v209_v43 = vpop.permute.xlu1 %208  ;;  %v207_v44 = vpop.permute.xlu0 %206 }
 0x22d   :  { %v223_v45 = vsel %vm547_vm3, %v193_v29, %v209_v43  ;;  %v222_v46 = vsel %vm547_vm3, %v191_v30, %v207_v44 }
 0x22e   :  { %236 = vrot.lane.b32.xlu1 %v223_v45, %s451_s25  ;;  %234 = vrot.lane.b32.xlu0 %v222_v46, %s451_s25 }
 0x230   :  { %v213_v47 = vpop.permute.xlu1 %212  ;;  %v211_v48 = vpop.permute.xlu0 %210 }
 0x231   :  { %v225_v49 = vsel %vm547_vm3, %v197_v32, %v213_v47  ;;  %v224_v50 = vsel %vm547_vm3, %v195_v33, %v211_v48 }
 0x232   :  { %240 = vrot.lane.b32.xlu1 %v225_v49, %s451_s25  ;;  %238 = vrot.lane.b32.xlu0 %v224_v50, %s451_s25 }
 0x236   :  { %244 = vrot.lane.b32.xlu1 %v219_v37, %s452_s26  ;;  %242 = vrot.lane.b32.xlu0 %v218_v38, %s452_s26 }
 0x23a   :  { %248 = vrot.lane.b32.xlu1 %v221_v41, %s452_s26  ;;  %246 = vrot.lane.b32.xlu0 %v220_v42, %s452_s26 }
 0x23e   :  { %252 = vrot.lane.b32.xlu1 %v223_v45, %s452_s26  ;;  %250 = vrot.lane.b32.xlu0 %v222_v46, %s452_s26 }
 0x242   :  { %256 = vrot.lane.b32.xlu1 %v225_v49, %s452_s26  ;;  %254 = vrot.lane.b32.xlu0 %v224_v50, %s452_s26 }
 0x298   :  { %v229_v51 = vpop.permute.xlu1 %228  ;;  %v227_v52 = vpop.permute.xlu0 %226 }
 0x29c   :  { %v233_v53 = vpop.permute.xlu1 %232  ;;  %v231_v54 = vpop.permute.xlu0 %230 }
 0x2a0   :  { %v237_v55 = vpop.permute.xlu1 %236  ;;  %v235_v56 = vpop.permute.xlu0 %234 }
 0x2a4   :  { %v241_v58 = vpop.permute.xlu1 %240  ;;  %v239_v59 = vpop.permute.xlu0 %238 }
 0x2a8   :  { %v245_v61 = vpop.permute.xlu1 %244  ;;  %v243_v62 = vpop.permute.xlu0 %242 }
 0x2a9   :  { %v263_v63 = vsel %vm568_vm4, %v229_v51, %v245_v61  ;;  %v262_v0 = vsel %vm568_vm4, %v227_v52, %v243_v62 }
 0x2aa   :  { %272 = vrot.lane.b32.xlu1 %v263_v63, %s453_s27  ;;  %270 = vrot.lane.b32.xlu0 %v262_v0, %s453_s27 }
 0x2ac   :  { %v249_v1 = vpop.permute.xlu1 %248  ;;  %v247_v2 = vpop.permute.xlu0 %246 }
 0x2ad   :  { %v265_v3 = vsel %vm568_vm4, %v233_v53, %v249_v1  ;;  %v264_v4 = vsel %vm568_vm4, %v231_v54, %v247_v2 }
 0x2ae   :  { %276 = vrot.lane.b32.xlu1 %v265_v3, %s453_s27  ;;  %274 = vrot.lane.b32.xlu0 %v264_v4, %s453_s27 }
 0x2b0   :  { %v253_v5 = vpop.permute.xlu1 %252  ;;  %v251_v6 = vpop.permute.xlu0 %250 }
 0x2b1   :  { %v267_v7 = vsel %vm568_vm4, %v237_v55, %v253_v5  ;;  %v266_v8 = vsel %vm568_vm4, %v235_v56, %v251_v6 }
 0x2b2   :  { %280 = vrot.lane.b32.xlu1 %v267_v7, %s453_s27  ;;  %278 = vrot.lane.b32.xlu0 %v266_v8, %s453_s27 }
 0x2b4   :  { %v257_v9 = vpop.permute.xlu1 %256  ;;  %v255_v10 = vpop.permute.xlu0 %254 }
 0x2b5   :  { %v269_v11 = vsel %vm568_vm4, %v241_v58, %v257_v9  ;;  %v268_v12 = vsel %vm568_vm4, %v239_v59, %v255_v10 }
 0x2b6   :  { %284 = vrot.lane.b32.xlu1 %v269_v11, %s453_s27  ;;  %282 = vrot.lane.b32.xlu0 %v268_v12, %s453_s27 }
 0x2ba   :  { %288 = vrot.lane.b32.xlu1 %v263_v63, %s454_s28  ;;  %286 = vrot.lane.b32.xlu0 %v262_v0, %s454_s28 }
 0x2be   :  { %292 = vrot.lane.b32.xlu1 %v265_v3, %s454_s28  ;;  %290 = vrot.lane.b32.xlu0 %v264_v4, %s454_s28 }
 0x2c2   :  { %296 = vrot.lane.b32.xlu1 %v267_v7, %s454_s28  ;;  %294 = vrot.lane.b32.xlu0 %v266_v8, %s454_s28 }
 0x2c6   :  { %300 = vrot.lane.b32.xlu1 %v269_v11, %s454_s28  ;;  %298 = vrot.lane.b32.xlu0 %v268_v12, %s454_s28 }
 0x31c   :  { %v273_v14 = vpop.permute.xlu1 %272  ;;  %v271_v15 = vpop.permute.xlu0 %270 }
 0x320   :  { %v277_v16 = vpop.permute.xlu1 %276  ;;  %v275_v17 = vpop.permute.xlu0 %274 }
 0x324   :  { %v281_v18 = vpop.permute.xlu1 %280  ;;  %v279_v19 = vpop.permute.xlu0 %278 }
 0x328   :  { %v285_v21 = vpop.permute.xlu1 %284  ;;  %v283_v22 = vpop.permute.xlu0 %282 }
 0x32c   :  { %v289_v24 = vpop.permute.xlu1 %288  ;;  %v287_v25 = vpop.permute.xlu0 %286 }
 0x32d   :  { %v307_v26 = vsel %vm589_vm5, %v273_v14, %v289_v24  ;;  %v306_v27 = vsel %vm589_vm5, %v271_v15, %v287_v25 }
 0x32e   :  { %316 = vrot.lane.b32.xlu1 %v307_v26, %s455_s29  ;;  %314 = vrot.lane.b32.xlu0 %v306_v27, %s455_s29 }
 0x330   :  { %v293_v28 = vpop.permute.xlu1 %292  ;;  %v291_v29 = vpop.permute.xlu0 %290 }
 0x331   :  { %v309_v13 = vsel %vm589_vm5, %v277_v16, %v293_v28  ;;  %v308_v30 = vsel %vm589_vm5, %v275_v17, %v291_v29 }
 0x332   :  { %320 = vrot.lane.b32.xlu1 %v309_v13, %s455_s29  ;;  %318 = vrot.lane.b32.xlu0 %v308_v30, %s455_s29 }
 0x334   :  { %v297_v31 = vpop.permute.xlu1 %296  ;;  %v295_v32 = vpop.permute.xlu0 %294 }
 0x335   :  { %v311_v33 = vsel %vm589_vm5, %v281_v18, %v297_v31  ;;  %v310_v34 = vsel %vm589_vm5, %v279_v19, %v295_v32 }
 0x336   :  { %324 = vrot.lane.b32.xlu1 %v311_v33, %s455_s29  ;;  %322 = vrot.lane.b32.xlu0 %v310_v34, %s455_s29 }
 0x338   :  { %v301_v35 = vpop.permute.xlu1 %300  ;;  %v299_v36 = vpop.permute.xlu0 %298 }
 0x339   :  { %v313_v37 = vsel %vm589_vm5, %v285_v21, %v301_v35  ;;  %v312_v38 = vsel %vm589_vm5, %v283_v22, %v299_v36 }
 0x33a   :  { %328 = vrot.lane.b32.xlu1 %v313_v37, %s455_s29  ;;  %326 = vrot.lane.b32.xlu0 %v312_v38, %s455_s29 }
 0x3a0   :  { %v317_v39 = vpop.permute.xlu1 %316  ;;  %v315_v40 = vpop.permute.xlu0 %314 }
 0x3a1   :  { %331 = vst [vmem:[#allocation7 + $0x8] sm:$0xff] %v317_v39  ;;  %330 = vst [vmem:[#allocation7] sm:$0xff] %v315_v40 }
 0x3a4   :  { %v321_v41 = vpop.permute.xlu1 %320  ;;  %v319_v42 = vpop.permute.xlu0 %318 }
 0x3a5   :  { %333 = vst [vmem:[#allocation7 + $0x18] sm:$0xff] %v321_v41  ;;  %332 = vst [vmem:[#allocation7 + $0x10] sm:$0xff] %v319_v42 }
 0x3a8   :  { %v325_v43 = vpop.permute.xlu1 %324  ;;  %v323_v44 = vpop.permute.xlu0 %322 }
 0x3a9   :  { %335 = vst [vmem:[#allocation7 + $0x28] sm:$0xff] %v325_v43  ;;  %334 = vst [vmem:[#allocation7 + $0x20] sm:$0xff] %v323_v44 }
 0x3ac   :  { %v329_v45 = vpop.permute.xlu1 %328  ;;  %v327_v46 = vpop.permute.xlu0 %326 }
 0x3ad   :  { %337 = vst [vmem:[#allocation7 + $0x38] sm:$0xff] %v329_v45  ;;  %336 = vst [vmem:[#allocation7 + $0x30] sm:$0xff] %v327_v46 }
 0x3ae PF:  { %p378_p6 = scmp.ne.s32.totalorder %s618_s0, 0 }
 0x3b0   :  { %341 = sbr.rel (%p378_p6) target bundleno = 954 (0x3ba), region = 17 }
 0x3b5   :  { %v342_v47 = vld [vmem:[#allocation4] sm:$0xff]  ;;  %v343_v48 = vld [vmem:[#allocation4 + $0x8] sm:$0xff]  ;;  %v344_v49 = vld [vmem:[#allocation4 + $0x10] sm:$0xff] }
 0x3b6   :  { %350 = vst [vmem:[#allocation7] sm:$0xff] %v342_v47  ;;  %351 = vst [vmem:[#allocation7 + $0x8] sm:$0xff] %v343_v48  ;;  %v345_v50 = vld [vmem:[#allocation4 + $0x18] sm:$0xff]  ;;  %v346_v51 = vld [vmem:[#allocation4 + $0x20] sm:$0xff] }
 0x3b7   :  { %352 = vst [vmem:[#allocation7 + $0x10] sm:$0xff] %v344_v49  ;;  %v347_v52 = vld [vmem:[#allocation4 + $0x28] sm:$0xff]  ;;  %353 = vst [vmem:[#allocation7 + $0x18] sm:$0xff] %v345_v50  ;;  %v348_v53 = vld [vmem:[#allocation4 + $0x30] sm:$0xff] }
 0x3b8   :  { %354 = vst [vmem:[#allocation7 + $0x20] sm:$0xff] %v346_v51  ;;  %355 = vst [vmem:[#allocation7 + $0x28] sm:$0xff] %v347_v52  ;;  %v349_v54 = vld [vmem:[#allocation4 + $0x38] sm:$0xff] }
 0x3b9   :  { %356 = vst [vmem:[#allocation7 + $0x30] sm:$0xff] %v348_v53  ;;  %357 = vst [vmem:[#allocation7 + $0x38] sm:$0xff] %v349_v54 }
 0x3ba PF:  { %s456_s4 = smov [#allocation7]  }
 0x3bb   :  { %s363_s0 = sshll.u32 %s456_s4, 4  ;;  %s364_s0 = int_to_ptr.vmem [resolvable:$true] %s363_s0 }
 0x3bc   :  { %s416_s5 = scalar_lea.vmem %s364_s0, 1024  ;;  %p421_p8 = scmp.lt.s32.totalorder %s364_s0, %s364_s0 }
 0x3bd   :  { %p417_p7 = scmp.ne.s32.totalorder %s364_s0, %s416_s5  ;;  %p422_p9 = scmp.lt.s32.totalorder %s416_s5, %s416_s5 }
 0x3bf   :  { %p423_p10 = por %p422_p9, %p421_p8 }
 0x3c1   :  { %p424_p11 = pnand %p423_p10, %p417_p7 }
 0x3c3   :  { %427 = shalt.err (!%p424_p11)
}
 0x3c4   :  { %369 = dma.vmem_to_hbm [thread:$0]  %s364_s0, 1024, %s620_s2, [#allocation6], %s441_s12, %s441_s12, %s442_s13  }
 0x3c5   :  { %438 = dma.done.wait [#allocation6], 1024  }
 0x3c6   :  { %439 = vsyncadd [#allocation6], 4294966272 }
 0x3c7   :  { %373 = vsyncpa [#allocation5], 1 }
 0x3c8   :  { %374 = vsyncpa [#allocation6], 1 }

</bundles_post_ra>
